<compile_context>
chip_gen: v7x
topology: tpu7x:2x2x1
jax: 0.10.0
libtpu: 0.0.40
codegen_flags: <defaults>
</compile_context>

<pallas_src>
import jax
import jax.numpy as jnp
from jax import lax
from jax.experimental import pallas as pl
from jax.experimental.pallas import tpu as pltpu

BN_EPS = 1e-5
LEAKY_SLOPE = 0.01  # torch.nn.LeakyReLU default negative_slope
HW = 81             # fixed 9x9 board (fc1 = 81 -> 64)


def _leaky_relu(x):
    return jnp.where(x > 0, x, LEAKY_SLOPE * x)


def _choose_tile_b(B, C, target_bytes=4 << 20):
    """Batch tile: largest row-count whose (TB, C, 81) f32 block is ~target_bytes."""
    row_bytes = C * HW * 4
    tb = max(8, target_bytes // row_bytes)
    tb = min(tb, 1024)
    if tb >= B:
        return B                      # single tile: block == full array (always legal)
    if tb >= 64:
        tb = max(128, (tb // 128) * 128)   # lane-dense output tiles
    else:
        tb = max(8, (tb // 8) * 8)         # huge-C fallback: keep sublane alignment
    return tb


# ---------------------------------------------------------------------------
# Pass 1: 1x1 conv over channels.  x block (TB, C, 81); conv weights/bias in SMEM.
# ---------------------------------------------------------------------------
def _conv1x1_kernel(x_ref, cw_ref, cb_ref, conv_ref):
    # C is a compile-time constant -> static unroll = C VPU multiply-adds on
    # (TB, 81) lane-major tiles.  No transpose, no XLU reduction.
    C = x_ref.shape[1]
    acc = x_ref[:, 0, :] * cw_ref[0]
    for c in range(1, C):
        acc = acc + x_ref[:, c, :] * cw_ref[c]
    conv_ref[...] = acc + cb_ref[0]


# ---------------------------------------------------------------------------
# Pass 2: BN (pre-folded scale/shift) -> LeakyReLU -> fc1 -> LeakyReLU -> fc2 -> tanh
# ---------------------------------------------------------------------------
def _head_kernel(conv_ref, sc_ref, w1_ref, b1_ref, w2_ref, out_ref):
    conv = conv_ref[...]                       # (TB, 81) f32
    scale = sc_ref[0]                          # gamma * rsqrt(var + eps)
    shift = sc_ref[1]                          # beta - mean * scale
    fc2_b = sc_ref[2]

    h = _leaky_relu(conv * scale + shift)      # BN (training-mode stats, folded) + LeakyReLU

    # fc1 on the MXU with lane-dense padded weights (81, 128); padded columns are
    # exactly zero (zero weights + zero bias), so they contribute nothing.
    h1 = jnp.dot(h, w1_ref[...], preferred_element_type=jnp.float32) + b1_ref[...]
    h1 = _leaky_relu(h1)                       # (TB, 128)

    # fc2 (out dim 1) on the VPU: broadcast-multiply + lane reduce, then tanh.
    y = jnp.sum(h1 * w2_ref[...], axis=-1) + fc2_b      # (TB,)
    out_ref[...] = jnp.tanh(y).reshape(1, 1, -1)         # lane-dense (1, 1, TB) store


# ---------------------------------------------------------------------------
# Wrapper
# ---------------------------------------------------------------------------
def value_head_forward(x_nchw, params, tile_b=None):
    B, C, H, W = x_nchw.shape
    assert (H, W) == (9, 9), "ValueHead hard-codes a 9x9 spatial grid (fc1 = 81->64)"

    # NCHW -> (B, C, 81): a free reshape, NO transpose (no extra HBM pass over x).
    x = x_nchw.reshape(B, C, HW).astype(jnp.float32)

    tb = tile_b if tile_b is not None else _choose_tile_b(B, C)
    nb = pl.cdiv(B, tb)

    cw = params["conv_w"].astype(jnp.float32).reshape(C)
    cb = params["conv_b"].astype(jnp.float32).reshape(1)

    cparams = pltpu.CompilerParams(
        dimension_semantics=("parallel",),          # megacore-shardable batch axis
        vmem_limit_bytes=32 * 1024 * 1024,
    )
    smem = pl.BlockSpec(memory_space=pltpu.MemorySpace.SMEM)

    # ---- pass 1: conv map (B, 81) ----------------------------------------
    conv = pl.pallas_call(
        _conv1x1_kernel,
        out_shape=jax.ShapeDtypeStruct((B, HW), jnp.float32),
        grid=(nb,),
        in_specs=[
            pl.BlockSpec((tb, C, HW), lambda i: (i, 0, 0)),
            smem,   # conv_w (C,)
            smem,   # conv_b (1,)
        ],
        out_specs=pl.BlockSpec((tb, HW), lambda i: (i, 0)),
        compiler_params=cparams,
    )(x, cw, cb)

    # ---- global BatchNorm2d(1) batch statistics (exact, across all tiles) --
    # Tiny reduction over the (B, 81) conv map; done between the two Pallas passes
    # so both stay batch-parallel.  Folded into a single scale/shift pair.
    mean = jnp.mean(conv)
    var = jnp.mean(jnp.square(conv - mean))          # biased, like torch BN training mode
    inv_std = lax.rsqrt(var + BN_EPS)
    scale = params["bn_gamma"].astype(jnp.float32).reshape(()) * inv_std
    shift = params["bn_beta"].astype(jnp.float32).reshape(()) - mean * scale
    scalars = jnp.stack(
        [scale, shift, params["fc2_b"].astype(jnp.float32).reshape(())])

    # fc weights padded to lane-dense shapes; padded tails are zero.
    w1 = jnp.pad(params["fc1_w"].astype(jnp.float32), ((0, 0), (0, 128 - 64)))        # (81, 128)
    b1 = jnp.pad(params["fc1_b"].astype(jnp.float32).reshape(1, 64), ((0, 0), (0, 64)))  # (1, 128)
    w2 = jnp.pad(params["fc2_w"].astype(jnp.float32).reshape(1, 64), ((0, 0), (0, 64)))  # (1, 128)

    # ---- pass 2: BN + MLP head, lane-dense output --------------------------
    out = pl.pallas_call(
        _head_kernel,
        out_shape=jax.ShapeDtypeStruct((nb, 1, tb), jnp.float32),
        grid=(nb,),
        in_specs=[
            pl.BlockSpec((tb, HW), lambda i: (i, 0)),
            smem,                                        # [scale, shift, fc2_b]
            pl.BlockSpec((HW, 128), lambda i: (0, 0)),   # w1 resident in VMEM
            pl.BlockSpec((1, 128), lambda i: (0, 0)),    # b1 resident
            pl.BlockSpec((1, 128), lambda i: (0, 0)),    # w2 resident
        ],
        out_specs=pl.BlockSpec((1, 1, tb), lambda i: (i, 0, 0)),
        compiler_params=cparams,
    )(conv, scalars, w1, b1, w2)

    return out.reshape(-1)[:B].reshape(B, 1)


# ---------------------------------------------------------------------------
# Pure-JAX reference mirroring the PyTorch forward.
# ---------------------------------------------------------------------------
def value_head_ref(x_nchw, params):
    B, C, H, W = x_nchw.shape
    conv = jnp.einsum("bchw,c->bhw", x_nchw, params["conv_w"]) + params["conv_b"]
    mean = jnp.mean(conv)
    var = jnp.mean((conv - mean) ** 2)
    bn = (conv - mean) / jnp.sqrt(var + BN_EPS)
    bn = bn * params["bn_gamma"] + params["bn_beta"]
    h = _leaky_relu(bn).reshape(B, H * W)
    h1 = _leaky_relu(h @ params["fc1_w"] + params["fc1_b"])
    y = h1 @ params["fc2_w"][:, None] + params["fc2_b"]
    return jnp.tanh(y)


def init_params(key, num_channels):
    ks = jax.random.split(key, 6)
    return {
        "conv_w": 0.1 * jax.random.normal(ks[0], (num_channels,), jnp.float32),
        "conv_b": 0.1 * jax.random.normal(ks[1], (), jnp.float32),
        "bn_gamma": jnp.ones((), jnp.float32),   # PyTorch BatchNorm init
        "bn_beta": jnp.zeros((), jnp.float32),
        "fc1_w": 0.1 * jax.random.normal(ks[2], (81, 64), jnp.float32),  # fc1.weight.T
        "fc1_b": 0.1 * jax.random.normal(ks[3], (64,), jnp.float32),
        "fc2_w": 0.1 * jax.random.normal(ks[4], (64,), jnp.float32),     # fc2.weight[0]
        "fc2_b": 0.1 * jax.random.normal(ks[5], (), jnp.float32),
    }


if __name__ == "__main__":
    B, C = 2, 4  # batch=2, num_channels=4; spatial 9x9 is fixed by the module
    key = jax.random.PRNGKey(0)
    pkey, xkey = jax.random.split(key)
    params = init_params(pkey, C)
    x = jax.random.normal(xkey, (B, C, 9, 9), jnp.float32)

    out = jax.block_until_ready(value_head_forward(x, params))
    ref = jax.block_until_ready(value_head_ref(x, params))

    assert out.shape == (B, 1)
    assert jnp.allclose(out, ref, atol=1e-5, rtol=1e-5), (out, ref)
    print("KERNEL_OK")
</pallas_src>

<mosaic_0001>
module attributes {stable_mosaic.version = 11 : i64} {
  func.func @_conv1x1_kernel(%arg0: i32, %arg1: memref<2x4x81xf32, #tpu.memory_space<vmem>>, %arg2: memref<4xf32, #tpu.memory_space<smem>>, %arg3: memref<1xf32, #tpu.memory_space<smem>>, %arg4: memref<2x81xf32, #tpu.memory_space<vmem>>) attributes {dimension_semantics = [#tpu.dimension_semantics<parallel>], iteration_bounds = array<i64: 1>, scalar_prefetch = 0 : i64, scratch_operands = 0 : i64, tpu.core_type = #tpu.core_type<tc>, window_params = [{transform_indices = @transform_0, window_bounds = array<i64: 2, 4, 81>}, {transform_indices = @transform_1, window_bounds = array<i64: 4>}, {transform_indices = @transform_2, window_bounds = array<i64: 1>}, {transform_indices = @transform_3, window_bounds = array<i64: 2, 81>}]} {
    %c0 = arith.constant 0 : index
    %c0_0 = arith.constant 0 : index
    %c0_1 = arith.constant 0 : index
    %0 = vector.load %arg1[%c0, %c0_0, %c0_1] : memref<2x4x81xf32, #tpu.memory_space<vmem>>, vector<2x1x81xf32>
    %1 = vector.shape_cast %0 : vector<2x1x81xf32> to vector<2x81xf32>
    %c0_2 = arith.constant 0 : index
    %2 = memref.load %arg2[%c0_2] : memref<4xf32, #tpu.memory_space<smem>>
    %3 = vector.broadcast %2 : f32 to vector<2x81xf32>
    %4 = arith.mulf %1, %3 : vector<2x81xf32>
    %c0_3 = arith.constant 0 : index
    %c1 = arith.constant 1 : index
    %c0_4 = arith.constant 0 : index
    %5 = vector.load %arg1[%c0_3, %c1, %c0_4] : memref<2x4x81xf32, #tpu.memory_space<vmem>>, vector<2x1x81xf32>
    %6 = vector.shape_cast %5 : vector<2x1x81xf32> to vector<2x81xf32>
    %c1_5 = arith.constant 1 : index
    %7 = memref.load %arg2[%c1_5] : memref<4xf32, #tpu.memory_space<smem>>
    %8 = vector.broadcast %7 : f32 to vector<2x81xf32>
    %9 = arith.mulf %6, %8 : vector<2x81xf32>
    %10 = arith.addf %4, %9 : vector<2x81xf32>
    %c0_6 = arith.constant 0 : index
    %c2 = arith.constant 2 : index
    %c0_7 = arith.constant 0 : index
    %11 = vector.load %arg1[%c0_6, %c2, %c0_7] : memref<2x4x81xf32, #tpu.memory_space<vmem>>, vector<2x1x81xf32>
    %12 = vector.shape_cast %11 : vector<2x1x81xf32> to vector<2x81xf32>
    %c2_8 = arith.constant 2 : index
    %13 = memref.load %arg2[%c2_8] : memref<4xf32, #tpu.memory_space<smem>>
    %14 = vector.broadcast %13 : f32 to vector<2x81xf32>
    %15 = arith.mulf %12, %14 : vector<2x81xf32>
    %16 = arith.addf %10, %15 : vector<2x81xf32>
    %c0_9 = arith.constant 0 : index
    %c3 = arith.constant 3 : index
    %c0_10 = arith.constant 0 : index
    %17 = vector.load %arg1[%c0_9, %c3, %c0_10] : memref<2x4x81xf32, #tpu.memory_space<vmem>>, vector<2x1x81xf32>
    %18 = vector.shape_cast %17 : vector<2x1x81xf32> to vector<2x81xf32>
    %c3_11 = arith.constant 3 : index
    %19 = memref.load %arg2[%c3_11] : memref<4xf32, #tpu.memory_space<smem>>
    %20 = vector.broadcast %19 : f32 to vector<2x81xf32>
    %21 = arith.mulf %18, %20 : vector<2x81xf32>
    %22 = arith.addf %16, %21 : vector<2x81xf32>
    %c0_12 = arith.constant 0 : index
    %23 = memref.load %arg3[%c0_12] : memref<1xf32, #tpu.memory_space<smem>>
    %24 = vector.broadcast %23 : f32 to vector<2x81xf32>
    %25 = arith.addf %22, %24 : vector<2x81xf32>
    %c0_13 = arith.constant 0 : index
    %c0_14 = arith.constant 0 : index
    %26 = vector.load %arg4[%c0_13, %c0_14] : memref<2x81xf32, #tpu.memory_space<vmem>>, vector<2x81xf32>
    tpu.vector_store %arg4[%c0_13, %c0_14], %25 {strides = array<i32>} : memref<2x81xf32, #tpu.memory_space<vmem>>, vector<2x81xf32>,
    return
  }
  func.func @transform_0(%arg0: i32) -> (i32, i32, i32) {
    %c0_i32 = arith.constant 0 : i32
    %c0_i32_0 = arith.constant 0 : i32
    %c0_i32_1 = arith.constant 0 : i32
    return %arg0, %c0_i32, %c0_i32_0 : i32, i32, i32
  }
  func.func @transform_1(%arg0: i32) -> i32 {
    %c0_i32 = arith.constant 0 : i32
    %c0_i32_0 = arith.constant 0 : i32
    return %c0_i32 : i32
  }
  func.func @transform_2(%arg0: i32) -> i32 {
    %c0_i32 = arith.constant 0 : i32
    %c0_i32_0 = arith.constant 0 : i32
    return %c0_i32 : i32
  }
  func.func @transform_3(%arg0: i32) -> (i32, i32) {
    %c0_i32 = arith.constant 0 : i32
    %c0_i32_0 = arith.constant 0 : i32
    return %arg0, %c0_i32 : i32, i32
  }
}

</mosaic_0001>

<bundles_post_ra>
// kernel: tpu_custom_call.1
= control target key start
LH: loop header
LB: loop body
LE: loop exit
PB: predicated region body
PF: predicated region fallthrough
CT: control target
= control target key end

     0   :  { %9 = vsyncpa [#allocation4], 0  ;;  %s226_s0 = inlined_call_operand.hbm [shape: f32[2,4,81], index: 0, kind: input, shape index: {}]   ;;  %s227_s1 = inlined_call_operand.vmem [shape: f32[4], index: 1, kind: input, shape index: {}]   ;;  %s228_s2 = inlined_call_operand.<no memory space> [shape: f32[1], index: 2, kind: input, shape index: {}]   ;;  %s229_s3 = inlined_call_operand.hbm [shape: f32[2,81], index: 3, kind: output, shape index: {}]  }
   0x1   :  { %10 = vsyncpa [#allocation6], 0 }
   0x2   :  { %11 = vsyncpa [#allocation5], 0  ;;  %s171_s12 = smov [#allocation3]   ;;  %s30_s16 = sshll.u32 %s227_s1, 4  ;;  %s31_s16 = int_to_ptr.vmem [resolvable:$true] %s30_s16 }
   0x3   :  { %s17_s13 = sshll.u32 %s171_s12, 4  ;;  %s109_s19 = scalar_lea.hbm %s226_s0, 128  ;;  %s18_s13 = int_to_ptr.vmem [resolvable:$true] %s17_s13 }
   0x4   :  { %p110_p0 = scmp.ne.s32.totalorder %s226_s0, %s109_s19  ;;  %p113_p1 = scmp.lt.u32.totalorder %s109_s19, %s226_s0 }
   0x6   :  { %p115_p2 = pnand %p113_p1, %p110_p0 }
   0x8   :  { %118 = shalt.err (!%p115_p2)
}
   0x9   :  { %s119_s24 = scalar_lea.vmem %s18_s13, 128  ;;  %p124_p4 = scmp.lt.s32.totalorder %s18_s13, %s18_s13 }
   0xa   :  { %p120_p3 = scmp.ne.s32.totalorder %s18_s13, %s119_s24  ;;  %p125_p5 = scmp.lt.s32.totalorder %s119_s24, %s119_s24 }
   0xc   :  { %p126_p6 = por %p125_p5, %p124_p4 }
   0xe   :  { %p127_p7 = pnand %p126_p6, %p120_p3 }
  0x10   :  { %130 = shalt.err (!%p127_p7)
}
  0x11   :  { %s172_s1 = smov 64   ;;  %s173_s25 = smov 4  }
  0x12   :  { %23 = dma.hbm_to_vmem [thread:$0]  %s226_s0, 128, %s18_s13, [#allocation4], %s172_s1, %s172_s1, %s173_s25  }
  0x13   :  { %s131_s28 = scalar_lea.vmem %s31_s16, 16  ;;  %p136_p9 = scmp.lt.s32.totalorder %s31_s16, %s31_s16 }
  0x14   :  { %p132_p8 = scmp.ne.s32.totalorder %s31_s16, %s131_s28  ;;  %p137_p10 = scmp.lt.s32.totalorder %s131_s28, %s131_s28 }
  0x16   :  { %p138_p11 = por %p137_p10, %p136_p9 }
  0x18   :  { %p139_p12 = pnand %p138_p11, %p132_p8 }
  0x1a   :  { %142 = shalt.err (!%p139_p12)
}
  0x1b   :  { %s174_s29 = smov [#allocation7]  }
  0x1c   :  { %33 = dma.vmem_to_smem %s31_s16, 16, %s174_s29, [#allocation6]  }
  0x1d   :  { %165 = dma.done.wait [#allocation4], 128  }
  0x1e   :  { %166 = vsyncadd [#allocation4], 4294967168 }
  0x1f   :  { %167 = dma.done.wait [#allocation6], 16  }
  0x20   :  { %168 = vsyncadd [#allocation6], 4294967280 }
  0x21   :  { %42 = sfence }
  0x22   :  { %s45_s30 = sld [smem:[#allocation7]]  ;;  %s101_s4 = sld [smem:[#allocation7 + $0x1]]  ;;  %v43_v0 = vld [vmem:[#allocation3] sm:$0x1]  ;;  %v44_v1 = vld [vmem:[#allocation3 + $0x4] sm:$0x1]  ;;  %v74_v24 = vstv %s228_s2 }
  0x23   :  { %s102_s5 = sld [smem:[#allocation7 + $0x2]]  ;;  %s103_s6 = sld [smem:[#allocation7 + $0x3]]  ;;  %v49_v2 = vld [vmem:[#allocation3 + $0x1] sm:$0x1]  ;;  %v50_v3 = vld [vmem:[#allocation3 + $0x5] sm:$0x1] }
  0x24   :  { %v57_v5 = vld [vmem:[#allocation3 + $0x2] sm:$0x1]  ;;  %v58_v6 = vld [vmem:[#allocation3 + $0x6] sm:$0x1]  ;;  %v65_v10 = vld [vmem:[#allocation3 + $0x3] sm:$0x1] }
  0x25   :  { %v66_v11 = vld [vmem:[#allocation3 + $0x7] sm:$0x1]  ;;  %s175_s8 = smov [#allocation8]   ;;  %vm80_vm0 = vcmask 1041409   ;;  %vm83_vm1 = vcmask 656384  }
  0x26   :  { %s91_s9 = sshll.u32 %s175_s8, 4  ;;  %s92_s9 = int_to_ptr.vmem [resolvable:$true] %s91_s9 }
  0x27   :  { %s143_s10 = scalar_lea.vmem %s92_s9, 32  ;;  %p148_p0 = scmp.lt.s32.totalorder %s92_s9, %s92_s9 }
  0x28   :  { %v46_v4 = vstv %s45_s30  ;;  %v52_v9 = vstv %s101_s4  ;;  %p144_p13 = scmp.ne.s32.totalorder %s92_s9, %s143_s10  ;;  %p149_p1 = scmp.lt.s32.totalorder %s143_s10, %s143_s10 }
  0x29   :  { %v47_v7 = vmul.f32 %v46_v4, %v43_v0  ;;  %v48_v8 = vmul.f32 %v46_v4, %v44_v1  ;;  %v53_v12 = vmul.f32 %v52_v9, %v49_v2  ;;  %v54_v13 = vmul.f32 %v52_v9, %v50_v3 }
  0x2a   :  { %v60_v14 = vstv %s102_s5  ;;  %v68_v17 = vstv %s103_s6  ;;  %p150_p2 = por %p149_p1, %p148_p0 }
  0x2b   :  { %v61_v15 = vmul.f32 %v60_v14, %v57_v5  ;;  %v62_v16 = vmul.f32 %v60_v14, %v58_v6  ;;  %v55_v18 = vadd.f32 %v53_v12, %v47_v7  ;;  %v56_v19 = vadd.f32 %v54_v13, %v48_v8 }
  0x2c   :  { %v69_v20 = vmul.f32 %v68_v17, %v65_v10  ;;  %v70_v21 = vmul.f32 %v68_v17, %v66_v11  ;;  %p151_p3 = pnand %p150_p2, %p144_p13 }
  0x2d   :  { %v63_v22 = vadd.f32 %v61_v15, %v55_v18  ;;  %v64_v23 = vadd.f32 %v62_v16, %v56_v19 }
  0x2f   :  { %v71_v25 = vadd.f32 %v69_v20, %v63_v22  ;;  %v72_v26 = vadd.f32 %v70_v21, %v64_v23 }
  0x31   :  { %v75_v27 = vadd.f32 %v74_v24, %v71_v25  ;;  %v76_v28 = vadd.f32 %v74_v24, %v72_v26 }
  0x33   :  { %v79_v29 = vrot.slane %v76_v28, 7 }
  0x35   :  { %v81_v30 = vsel %vm80_vm0, %v79_v29, %v75_v27 }
  0x36   :  { %84 = vst.msk [vmem:[#allocation8] sm:$0x3] %vm83_vm1, %v81_v30 }
  0x37   :  { %154 = shalt.err (!%p151_p3)
}
  0x38   :  { %s155_s12 = scalar_lea.hbm %s229_s3, 32 }
  0x39   :  { %p156_p4 = scmp.ne.s32.totalorder %s229_s3, %s155_s12  ;;  %p159_p5 = scmp.lt.u32.totalorder %s155_s12, %s229_s3 }
  0x3b   :  { %p161_p6 = pnand %p159_p5, %p156_p4 }
  0x3d   :  { %164 = shalt.err (!%p161_p6)
}
  0x3e   :  { %94 = dma.vmem_to_hbm [thread:$0]  %s92_s9, 32, %s229_s3, [#allocation5]  }
  0x3f   :  { %169 = dma.done.wait [#allocation5], 32  }
  0x40   :  { %170 = vsyncadd [#allocation5], 4294967264 }
  0x41   :  { %98 = vsyncpa [#allocation4], 1 }
  0x42   :  { %99 = vsyncpa [#allocation5], 1 }
  0x43   :  { %100 = vsyncpa [#allocation6], 1 }

</bundles_post_ra>
